<compile_context>
chip_gen: v5e
topology: v5e:2x2
jax: 0.10.0
libtpu: 0.0.40
codegen_flags: <defaults>
</compile_context>

<pallas_src>
import functools

import jax
import jax.numpy as jnp
from jax.experimental import pallas as pl
from jax.experimental.pallas import tpu as pltpu

LANE = 128


def _round_up(x, m):
    return ((x + m - 1) // m) * m


def _vmem_limit_bytes():
    """Generation-aware VMEM budget (v5e/v6e: 128 MiB physical, v7x: 64 MiB)."""
    cap = None
    try:
        cap = int(pltpu.get_tpu_info().vmem_capacity_bytes)
    except Exception:
        cap = None
    if not cap:
        kind = jax.devices()[0].device_kind.lower()
        cap = (64 if "v7" in kind else 128) * 1024 * 1024
    return min(cap * 3 // 4, 96 * 1024 * 1024)


def _row_geometry(n):
    """Row tile tm and tile-aware padded node count n_pad (n_pad % tm == 0).

    Prefers large tiles; only accepts a tile if the quadratic adjacency
    padding it implies stays modest (<= 12.5% extra rows)."""
    n128 = _round_up(max(n, LANE), LANE)
    if n128 <= 768:                      # whole row range fits one nice tile
        return n128, n128
    budget = n128 + n128 // 8
    for tm in (512, 384, 256):
        n_pad = _round_up(n128, tm)
        if n_pad <= budget:
            return tm, n_pad
    return LANE, n128                    # zero padding fallback


def _pick_tk(n_pad, tm, out_pad, out_bytes, budget):
    """Largest reduction tile (multiple of tm dividing n_pad, <=2048) whose
    aggregation working set fits the VMEM budget."""
    start = min(n_pad // tm, max(1, 2048 // tm))
    for mult in range(start, 0, -1):
        cand = mult * tm
        if n_pad % cand:
            continue
        foot = (3 * tm * cand                   # int8 adjacency, Buffered(3)
                + 2 * cand * out_pad * 2        # h_proj bf16, double-buffered
                + 2 * tm * out_pad * 2          # h_self bf16
                + 2 * tm * out_pad * out_bytes  # output tile
                + tm * out_pad * 4              # f32 accumulator scratch
                + 2 * tm * 4 + 2 * out_pad * 4)  # deg_inv + bias
        if foot <= budget:
            return cand
    return tm


def _bspec(shape, index_map, buffers=None):
    """BlockSpec with optional pipeline_mode; falls back cleanly if the
    running jax does not support the kwarg."""
    if buffers is not None:
        try:
            return pl.BlockSpec(shape, index_map,
                                pipeline_mode=pl.Buffered(buffers))
        except Exception:
            pass
    return pl.BlockSpec(shape, index_map)


# --------------------------------------------------------------------------
# Kernels
# --------------------------------------------------------------------------
def _proj_kernel(x_ref, w_ref, hproj_ref, hself_ref):
    c = hproj_ref.shape[-1]
    if c >= 256:
        # Split dots: avoid a (tm, 2*out_pad) f32 intermediate (spills).
        x = x_ref[...]
        hproj_ref[...] = jnp.dot(
            x, w_ref[:, :c], preferred_element_type=jnp.float32
        ).astype(hproj_ref.dtype)
        hself_ref[...] = jnp.dot(
            x, w_ref[:, c:], preferred_element_type=jnp.float32
        ).astype(hself_ref.dtype)
    else:
        # One wide MXU matmul fills the 256-wide MXU N dimension.
        h = jnp.dot(x_ref[...], w_ref[...], preferred_element_type=jnp.float32)
        hproj_ref[...] = h[:, :c].astype(hproj_ref.dtype)
        hself_ref[...] = h[:, c:].astype(hself_ref.dtype)


def _agg_kernel(adj_ref, hproj_ref, hself_ref, dinv_ref, bias_ref, out_ref,
                acc_ref, *, apply_relu: bool):
    k = pl.program_id(1)

    @pl.when(k == 0)
    def _():
        acc_ref[...] = jnp.zeros_like(acc_ref)

    # int8 edge counts -> bf16 (exact small integers), bf16 x bf16 MXU matmul.
    a = adj_ref[...].astype(hproj_ref.dtype)
    acc_ref[...] += jnp.dot(a, hproj_ref[...],
                            preferred_element_type=jnp.float32)

    @pl.when(k == pl.num_programs(1) - 1)
    def _():
        # Exact f32 per-row mean normalization + self path + bias epilogue.
        r = (acc_ref[...] * dinv_ref[...]
             + hself_ref[...].astype(jnp.float32) + bias_ref[...])
        if apply_relu:
            r = jnp.maximum(r, 0.0)
        out_ref[...] = r.astype(out_ref.dtype)


# --------------------------------------------------------------------------
# Per-layer pallas_call wrappers
# --------------------------------------------------------------------------
def _project(x_pad, w_cat, *, tm, vmem_limit):
    n_pad, in_pad = x_pad.shape
    out2 = w_cat.shape[1]
    out_pad = out2 // 2
    # Constant-index weight: single-buffer it when large (halves residency).
    w_big = (w_cat.size * w_cat.dtype.itemsize) > (4 << 20)
    return pl.pallas_call(
        _proj_kernel,
        out_shape=(jax.ShapeDtypeStruct((n_pad, out_pad), jnp.bfloat16),
                   jax.ShapeDtypeStruct((n_pad, out_pad), jnp.bfloat16)),
        grid=(n_pad // tm,),
        in_specs=[
            pl.BlockSpec((tm, in_pad), lambda i: (i, 0)),          # x rows
            _bspec((in_pad, out2), lambda i: (0, 0),
                   buffers=1 if w_big else None),                  # [W_l^T|W_r^T]
        ],
        out_specs=(
            pl.BlockSpec((tm, out_pad), lambda i: (i, 0)),         # h_proj bf16
            pl.BlockSpec((tm, out_pad), lambda i: (i, 0)),         # h_self bf16
        ),
        compiler_params=pltpu.CompilerParams(
            dimension_semantics=("parallel",),
            vmem_limit_bytes=vmem_limit),
    )(x_pad, w_cat)


def _aggregate(adj_i8, h_proj, h_self, deg_inv, bias, *, tm, apply_relu,
               out_dtype, vmem_limit):
    n_pad = adj_i8.shape[0]
    out_pad = h_proj.shape[1]
    out_bytes = jnp.dtype(out_dtype).itemsize
    tk = _pick_tk(n_pad, tm, out_pad, out_bytes, budget=vmem_limit // 2)
    ksteps = n_pad // tk
    kern = functools.partial(_agg_kernel, apply_relu=apply_relu)
    return pl.pallas_call(
        kern,
        out_shape=jax.ShapeDtypeStruct((n_pad, out_pad), out_dtype),
        grid=(n_pad // tm, ksteps),                    # reduction (K) last
        in_specs=[
            _bspec((tm, tk), lambda i, k: (i, k),
                   buffers=3 if ksteps >= 3 else None),       # int8 adjacency
            pl.BlockSpec((tk, out_pad), lambda i, k: (k, 0)),  # h_proj K slab
            pl.BlockSpec((tm, out_pad), lambda i, k: (i, 0)),  # h_self (bf16)
            pl.BlockSpec((tm, 1), lambda i, k: (i, 0)),        # 1/deg (f32)
            pl.BlockSpec((1, out_pad), lambda i, k: (0, 0)),   # bias (f32)
        ],
        out_specs=pl.BlockSpec((tm, out_pad), lambda i, k: (i, 0)),
        scratch_shapes=[pltpu.VMEM((tm, out_pad), jnp.float32)],
        compiler_params=pltpu.CompilerParams(
            dimension_semantics=("parallel", "arbitrary"),
            vmem_limit_bytes=vmem_limit),
    )(adj_i8, h_proj, h_self, deg_inv, bias)


# --------------------------------------------------------------------------
# Model: parameter / graph prep + forward
# --------------------------------------------------------------------------
def init_params(key, in_channels, hidden_channels, out_channels, num_layers=2):
    """Raw PyTorch-layout params: (W_l (out,in), W_r (out,in), b_l (out,))."""
    dims = [in_channels] + [hidden_channels] * (num_layers - 1) + [out_channels]
    params = []
    for l in range(num_layers):
        fin, fout = dims[l], dims[l + 1]
        key, k1, k2 = jax.random.split(key, 3)
        scale = (6.0 / (fin + fout)) ** 0.5  # glorot-uniform, deterministic
        w_l = jax.random.uniform(k1, (fout, fin), jnp.float32, -scale, scale)
        w_r = jax.random.uniform(k2, (fout, fin), jnp.float32, -scale, scale)
        b_l = jnp.zeros((fout,), jnp.float32)
        params.append((w_l, w_r, b_l))
    return params


def prepare_params(raw_params):
    """Hoisted, one-time: transpose, stack [W_l^T | W_r^T], pad to 128, bf16."""
    prepared = []
    for (w_l, w_r, b_l) in raw_params:
        out_dim, in_dim = w_l.shape
        in_pad = _round_up(in_dim, LANE)
        out_pad = _round_up(out_dim, LANE)
        w_cat = jnp.zeros((in_pad, 2 * out_pad), jnp.float32)
        w_cat = w_cat.at[:in_dim, :out_dim].set(w_l.T)
        w_cat = w_cat.at[:in_dim, out_pad:out_pad + out_dim].set(w_r.T)
        bias = jnp.zeros((1, out_pad), jnp.float32).at[0, :out_dim].set(b_l)
        prepared.append(dict(w_cat=w_cat.astype(jnp.bfloat16), bias=bias,
                             in_dim=in_dim, out_dim=out_dim,
                             in_pad=in_pad, out_pad=out_pad))
    return prepared


def prepare_graph(edge_index, num_nodes):
    """One-time padded int8 edge-count adjacency + exact f32 per-row 1/deg.

    PyG 'mean' aggregation counts multi-edges, so we keep integer counts
    (exact in int8 / bf16) and fold the 1/deg scale into the kernel epilogue.
    """
    tm, n_pad = _row_geometry(num_nodes)
    src, dst = edge_index[0], edge_index[1]
    counts = jnp.zeros((n_pad, n_pad), jnp.float32).at[dst, src].add(1.0)
    deg = counts.sum(axis=1, keepdims=True)
    deg_inv = (1.0 / jnp.maximum(deg, 1.0)).astype(jnp.float32)  # (n_pad, 1)
    adj_i8 = counts.astype(jnp.int8)   # assumes edge multiplicity < 128
    return dict(adj=adj_i8, deg_inv=deg_inv, n=num_nodes, n_pad=n_pad, tm=tm)


def sage_forward(prepared_params, graph, x):
    """SAGE.forward: conv -> relu -> dropout(eval=identity) ... -> conv."""
    n, in_c = x.shape
    n_pad, tm = graph["n_pad"], graph["tm"]
    vmem_limit = _vmem_limit_bytes()

    # Pad + cast features once; zero padding keeps real-row math exact.
    h = jnp.zeros((n_pad, prepared_params[0]["in_pad"]), jnp.bfloat16)
    h = h.at[:n, :in_c].set(x.astype(jnp.bfloat16))

    num_layers = len(prepared_params)
    for li, p in enumerate(prepared_params):
        last = li == num_layers - 1
        h_proj, h_self = _project(h, p["w_cat"], tm=tm, vmem_limit=vmem_limit)
        h = _aggregate(graph["adj"], h_proj, h_self, graph["deg_inv"],
                       p["bias"], tm=tm, apply_relu=not last,
                       out_dtype=jnp.float32 if last else jnp.bfloat16,
                       vmem_limit=vmem_limit)
        # F.dropout(p=0.5, training=False) == identity
    return h[:n, :prepared_params[-1]["out_dim"]]


# --------------------------------------------------------------------------
if __name__ == "__main__":
    key = jax.random.PRNGKey(0)
    N, E = 64, 256
    in_c, hid_c, out_c = 32, 64, 16

    k_x, k_e, k_p = jax.random.split(key, 3)
    x = jax.random.normal(k_x, (N, in_c), jnp.float32)
    edge_index = jax.random.randint(k_e, (2, E), 0, N, dtype=jnp.int32)

    raw_params = init_params(k_p, in_c, hid_c, out_c, num_layers=2)
    params = prepare_params(raw_params)
    graph = prepare_graph(edge_index, N)

    out = sage_forward(params, graph, x)
    out = jax.block_until_ready(out)
    assert out.shape == (N, out_c)

    # pure-JAX f32 reference (kernel runs bf16 features/weights + f32
    # accumulation and exact f32 mean normalization -> loose-ish tolerance).
    adj_norm_ref = (graph["adj"].astype(jnp.float32)
                    * graph["deg_inv"])[:N, :N]

    def ref(params_raw, x, adj):
        h = x
        for i, (w_l, w_r, b_l) in enumerate(params_raw):
            y = (adj @ h) @ w_l.T + b_l + h @ w_r.T
            if i < len(params_raw) - 1:
                y = jnp.maximum(y, 0.0)
            h = y
        return h

    r = ref(raw_params, x, adj_norm_ref)
    assert jnp.allclose(out, r, atol=1e-1, rtol=1e-1), (
        "mismatch vs reference: max abs diff %f"
        % float(jnp.max(jnp.abs(out - r))))

    print("KERNEL_OK")
</pallas_src>

<mosaic_0001>
module attributes {stable_mosaic.version = 11 : i64} {
  func.func @_proj_kernel(%arg0: i32, %arg1: memref<128x128xbf16, #tpu.memory_space<vmem>>, %arg2: memref<128x256xbf16, #tpu.memory_space<vmem>>, %arg3: memref<128x128xbf16, #tpu.memory_space<vmem>>, %arg4: memref<128x128xbf16, #tpu.memory_space<vmem>>) attributes {dimension_semantics = [#tpu.dimension_semantics<parallel>], iteration_bounds = array<i64: 1>, scalar_prefetch = 0 : i64, scratch_operands = 0 : i64, tpu.core_type = #tpu.core_type<tc>, window_params = [{transform_indices = @transform_0, window_bounds = array<i64: 128, 128>}, {pipeline_mode = #tpu.pipeline_mode<synchronous>, transform_indices = @transform_1, window_bounds = array<i64: 128, 256>}, {transform_indices = @transform_2, window_bounds = array<i64: 128, 128>}, {transform_indices = @transform_3, window_bounds = array<i64: 128, 128>}]} {
    %c0 = arith.constant 0 : index
    %c0_0 = arith.constant 0 : index
    %0 = vector.load %arg1[%c0, %c0_0] : memref<128x128xbf16, #tpu.memory_space<vmem>>, vector<128x128xbf16>
    %c0_1 = arith.constant 0 : index
    %c0_2 = arith.constant 0 : index
    %1 = vector.load %arg2[%c0_1, %c0_2] : memref<128x256xbf16, #tpu.memory_space<vmem>>, vector<128x256xbf16>
    %cst = arith.constant dense<0.000000e+00> : vector<128x256xf32>
    %2 = tpu.matmul %0, %1, %cst {dimension_numbers = #tpu.dot_dimension_numbers<[1], [0], [0], [1], [0, 0, 1, 1], [], []>} : vector<128x128xbf16>, vector<128x256xbf16>, vector<128x256xf32> -> vector<128x256xf32>
    %3 = vector.extract_strided_slice %2 {offsets = [0, 0], sizes = [128, 128], strides = [1, 1]} : vector<128x256xf32> to vector<128x128xf32>
    %4 = arith.truncf %3 : vector<128x128xf32> to vector<128x128xbf16>
    %c0_3 = arith.constant 0 : index
    %c0_4 = arith.constant 0 : index
    %5 = vector.load %arg3[%c0_3, %c0_4] : memref<128x128xbf16, #tpu.memory_space<vmem>>, vector<128x128xbf16>
    tpu.vector_store %arg3[%c0_3, %c0_4], %4 {strides = array<i32>} : memref<128x128xbf16, #tpu.memory_space<vmem>>, vector<128x128xbf16>,
    %6 = vector.extract_strided_slice %2 {offsets = [0, 128], sizes = [128, 128], strides = [1, 1]} : vector<128x256xf32> to vector<128x128xf32>
    %7 = arith.truncf %6 : vector<128x128xf32> to vector<128x128xbf16>
    %c0_5 = arith.constant 0 : index
    %c0_6 = arith.constant 0 : index
    %8 = vector.load %arg4[%c0_5, %c0_6] : memref<128x128xbf16, #tpu.memory_space<vmem>>, vector<128x128xbf16>
    tpu.vector_store %arg4[%c0_5, %c0_6], %7 {strides = array<i32>} : memref<128x128xbf16, #tpu.memory_space<vmem>>, vector<128x128xbf16>,
    return
  }
  func.func @transform_0(%arg0: i32) -> (i32, i32) {
    %c0_i32 = arith.constant 0 : i32
    %c0_i32_0 = arith.constant 0 : i32
    return %arg0, %c0_i32 : i32, i32
  }
  func.func @transform_1(%arg0: i32) -> (i32, i32) {
    %c0_i32 = arith.constant 0 : i32
    %c0_i32_0 = arith.constant 0 : i32
    %c0_i32_1 = arith.constant 0 : i32
    return %c0_i32, %c0_i32_0 : i32, i32
  }
  func.func @transform_2(%arg0: i32) -> (i32, i32) {
    %c0_i32 = arith.constant 0 : i32
    %c0_i32_0 = arith.constant 0 : i32
    return %arg0, %c0_i32 : i32, i32
  }
  func.func @transform_3(%arg0: i32) -> (i32, i32) {
    %c0_i32 = arith.constant 0 : i32
    %c0_i32_0 = arith.constant 0 : i32
    return %arg0, %c0_i32 : i32, i32
  }
}

</mosaic_0001>

<bundles_post_ra>
// kernel: tpu_custom_call.1
= control target key start
LH: loop header
LB: loop body
LE: loop exit
PB: predicated region body
PF: predicated region fallthrough
CT: control target
= control target key end

     0   :  { %9 = vsyncpa [#allocation3], 0  ;;  %s798_s0 = inlined_call_operand.hbm [shape: bf16[128,128], index: 0, kind: input, shape index: {}]   ;;  %s799_s1 = inlined_call_operand.hbm [shape: bf16[128,256], index: 1, kind: input, shape index: {}]   ;;  %s800_s2 = inlined_call_operand.hbm [shape: bf16[128,128], index: 2, kind: output, shape index: {0}]   ;;  %s801_s3 = inlined_call_operand.hbm [shape: bf16[128,128], index: 3, kind: output, shape index: {1}]  }
   0x1   :  { %10 = vsyncpa [#allocation6], 0 }
   0x2   :  { %11 = vsyncpa [#allocation4], 0 }
   0x3   :  { %12 = vsyncpa [#allocation9], 0  ;;  %s17_s14 = sshll.u32 %s798_s0, 4  ;;  %s749_s15 = smov [#allocation2]   ;;  %s18_s14 = int_to_ptr.hbm [resolvable:$true] %s17_s14 }
   0x4   :  { %s19_s16 = sshll.u32 %s749_s15, 4  ;;  %s30_s19 = sshll.u32 %s799_s1, 4  ;;  %s20_s16 = int_to_ptr.vmem [resolvable:$true] %s19_s16  ;;  %s31_s19 = int_to_ptr.hbm [resolvable:$true] %s30_s19 }
   0x5   :  { %s750_s20 = smov 64   ;;  %s751_s21 = smov 4  }
   0x6   :  { %25 = dma.hbm_to_vmem [thread:$0]  %s18_s14, 1024, %s20_s16, [#allocation3], %s750_s20, %s750_s20, %s751_s21  }
   0x7   :  { %s752_s22 = smov [#allocation5]   ;;  %s753_s24 = smov 128  }
   0x8   :  { %s32_s23 = sshll.u32 %s752_s22, 4  ;;  %s754_s0 = smov 8   ;;  %s33_s23 = int_to_ptr.vmem [resolvable:$true] %s32_s23 }
   0x9   :  { %38 = dma.hbm_to_vmem [thread:$0]  %s31_s19, 2048, %s33_s23, [#allocation6], %s753_s24, %s753_s24, %s754_s0  }
   0xa   :  { %741 = dma.done.wait [#allocation3], 1024  }
   0xb   :  { %742 = vsyncadd [#allocation3], 4294966272 }
   0xc   :  { %743 = dma.done.wait [#allocation6], 2048  }
   0xd   :  { %744 = vsyncadd [#allocation6], 4294965248  ;;  %v497_v0 = vld [vmem:[#allocation5 + $0x70] sm:$0xf]  ;;  %v526_v1 = vld [vmem:[#allocation5 + $0x74] sm:$0xf0] }
   0xe   :  { %v525_v2 = vld [vmem:[#allocation5 + $0x74] sm:$0xf]  ;;  %v498_v3 = vor.u32 %v526_v1, %v497_v0  ;;  %v499_v4 = vld [vmem:[#allocation5 + $0x78] sm:$0xf0]  ;;  %v489_v5 = vld [vmem:[#allocation5 + $0x60] sm:$0xf] }
   0xf   :  { %v524_v6 = vld [vmem:[#allocation5 + $0x64] sm:$0xf0]  ;;  %v502_v7 = vor.u32 %v525_v2, %v499_v4  ;;  %v523_v8 = vld [vmem:[#allocation5 + $0x64] sm:$0xf]  ;;  %v491_v9 = vld [vmem:[#allocation5 + $0x68] sm:$0xf0] }
  0x10   :  { %207 = vmatpush.bf16.msra.mxu0 %v498_v3  ;;  %621 = vmatpush.bf16.msra.mxu2 %v498_v3  ;;  %v490_v10 = vor.u32 %v524_v6, %v489_v5  ;;  %v494_v11 = vor.u32 %v523_v8, %v491_v9  ;;  %v481_v12 = vld [vmem:[#allocation5 + $0x50] sm:$0xf]  ;;  %v522_v13 = vld [vmem:[#allocation5 + $0x54] sm:$0xf0]  ;;  %v521_v14 = vld [vmem:[#allocation5 + $0x54] sm:$0xf] }
  0x11   :  { %256 = vmatpush.bf16.msra.mxu1 %v502_v7  ;;  %629 = vmatpush.bf16.msra.mxu3 %v502_v7  ;;  %v483_v15 = vld [vmem:[#allocation5 + $0x58] sm:$0xf0]  ;;  %v482_v16 = vor.u32 %v522_v13, %v481_v12  ;;  %v473_v18 = vld [vmem:[#allocation5 + $0x40] sm:$0xf]  ;;  %v520_v19 = vld [vmem:[#allocation5 + $0x44] sm:$0xf0] }
  0x12   :  { %v486_v17 = vor.u32 %v521_v14, %v483_v15  ;;  %v519_v20 = vld [vmem:[#allocation5 + $0x44] sm:$0xf]  ;;  %v475_v21 = vld [vmem:[#allocation5 + $0x48] sm:$0xf0]  ;;  %v474_v22 = vor.u32 %v520_v19, %v473_v18  ;;  %v465_v24 = vld [vmem:[#allocation5 + $0x30] sm:$0xf] }
  0x13   :  { %v478_v23 = vor.u32 %v519_v20, %v475_v21  ;;  %v518_v25 = vld [vmem:[#allocation5 + $0x34] sm:$0xf0]  ;;  %v517_v26 = vld [vmem:[#allocation5 + $0x34] sm:$0xf]  ;;  %v467_v27 = vld [vmem:[#allocation5 + $0x38] sm:$0xf0] }
  0x14   :  { %208 = vmatpush.bf16.msra.mxu0 %v490_v10  ;;  %622 = vmatpush.bf16.msra.mxu2 %v490_v10  ;;  %v466_v28 = vor.u32 %v518_v25, %v465_v24  ;;  %v470_v29 = vor.u32 %v517_v26, %v467_v27  ;;  %v457_v30 = vld [vmem:[#allocation5 + $0x20] sm:$0xf]  ;;  %v516_v31 = vld [vmem:[#allocation5 + $0x24] sm:$0xf0]  ;;  %v515_v32 = vld [vmem:[#allocation5 + $0x24] sm:$0xf] }
  0x15   :  { %257 = vmatpush.bf16.msra.mxu1 %v494_v11  ;;  %630 = vmatpush.bf16.msra.mxu3 %v494_v11  ;;  %v459_v33 = vld [vmem:[#allocation5 + $0x28] sm:$0xf0]  ;;  %v458_v34 = vor.u32 %v516_v31, %v457_v30  ;;  %v449_v36 = vld [vmem:[#allocation5 + $0x10] sm:$0xf]  ;;  %v514_v37 = vld [vmem:[#allocation5 + $0x14] sm:$0xf0] }
  0x16   :  { %v462_v35 = vor.u32 %v515_v32, %v459_v33  ;;  %v513_v38 = vld [vmem:[#allocation5 + $0x14] sm:$0xf]  ;;  %v451_v39 = vld [vmem:[#allocation5 + $0x18] sm:$0xf0]  ;;  %v450_v40 = vor.u32 %v514_v37, %v449_v36  ;;  %v441_v42 = vld [vmem:[#allocation5] sm:$0xf] }
  0x17   :  { %v454_v41 = vor.u32 %v513_v38, %v451_v39  ;;  %v512_v43 = vld [vmem:[#allocation5 + $0x4] sm:$0xf0]  ;;  %v511_v44 = vld [vmem:[#allocation5 + $0x4] sm:$0xf]  ;;  %v443_v45 = vld [vmem:[#allocation5 + $0x8] sm:$0xf0] }
  0x18   :  { %209 = vmatpush.bf16.msra.mxu0 %v482_v16  ;;  %623 = vmatpush.bf16.msra.mxu2 %v482_v16  ;;  %v442_v46 = vor.u32 %v512_v43, %v441_v42  ;;  %v446_v47 = vor.u32 %v511_v44, %v443_v45  ;;  %v503_v48 = vld [vmem:[#allocation2] sm:$0xff]  ;;  %v504_v50 = vld [vmem:[#allocation2 + $0x8] sm:$0xff]  ;;  %v505_v52 = vld [vmem:[#allocation2 + $0x10] sm:$0xff]  ;;  %s755_s1 = smov [#allocation7]   ;;  %s375_s28 = sshll.u32 %s800_s2, 4  ;;  %s376_s28 = int_to_ptr.hbm [resolvable:$true] %s375_s28 }
  0x19   :  { %258 = vmatpush.bf16.msra.mxu1 %v486_v17  ;;  %631 = vmatpush.bf16.msra.mxu3 %v486_v17  ;;  %v507_v49 = vld [vmem:[#allocation2 + $0x20] sm:$0xff]  ;;  %v508_v51 = vld [vmem:[#allocation2 + $0x28] sm:$0xff]  ;;  %v509_v53 = vld [vmem:[#allocation2 + $0x30] sm:$0xff]  ;;  %s373_s25 = sshll.u32 %s755_s1, 4  ;;  %s756_s29 = smov [#allocation8]   ;;  %s374_s25 = int_to_ptr.vmem [resolvable:$true] %s373_s25 }
  0x1a   :  { %v506_v54 = vld [vmem:[#allocation2 + $0x18] sm:$0xff]  ;;  %s386_s30 = sshll.u32 %s756_s29, 4  ;;  %s388_s6 = sshll.u32 %s801_s3, 4  ;;  %s387_s30 = int_to_ptr.vmem [resolvable:$true] %s386_s30  ;;  %s389_s6 = int_to_ptr.hbm [resolvable:$true] %s388_s6 }
  0x1b   :  { %v510_v55 = vld [vmem:[#allocation2 + $0x38] sm:$0xff] }
  0x1c   :  { %210 = vmatpush.bf16.msra.mxu0 %v474_v22  ;;  %624 = vmatpush.bf16.msra.mxu2 %v474_v22 }
  0x1d   :  { %259 = vmatpush.bf16.msra.mxu1 %v478_v23  ;;  %632 = vmatpush.bf16.msra.mxu3 %v478_v23 }
  0x20   :  { %211 = vmatpush.bf16.msra.mxu0 %v466_v28  ;;  %625 = vmatpush.bf16.msra.mxu2 %v466_v28 }
  0x21   :  { %260 = vmatpush.bf16.msra.mxu1 %v470_v29  ;;  %633 = vmatpush.bf16.msra.mxu3 %v470_v29 }
  0x24   :  { %212 = vmatpush.bf16.msra.mxu0 %v458_v34  ;;  %626 = vmatpush.bf16.msra.mxu2 %v458_v34 }
  0x25   :  { %261 = vmatpush.bf16.msra.mxu1 %v462_v35  ;;  %634 = vmatpush.bf16.msra.mxu3 %v462_v35 }
  0x28   :  { %213 = vmatpush.bf16.msra.mxu0 %v450_v40  ;;  %627 = vmatpush.bf16.msra.mxu2 %v450_v40 }
  0x29   :  { %262 = vmatpush.bf16.msra.mxu1 %v454_v41  ;;  %635 = vmatpush.bf16.msra.mxu3 %v454_v41 }
  0x2c   :  { %214 = vmatpush.bf16.msra.mxu0 %v442_v46  ;;  %628 = vmatpush.bf16.msra.mxu2 %v442_v46 }
  0x2d   :  { %263 = vmatpush.bf16.msra.mxu1 %v446_v47  ;;  %636 = vmatpush.bf16.msra.mxu3 %v446_v47 }
  0x2f   :  { %215 = vmatmul.bf16.vlgmr.msra.gmra.mxu0 %v503_v48  ;;  %235 = vmatmul.bf16.vlgmr.msra.gmra.mxu2 %v507_v49 }
  0x30   :  { %264 = vmatmul.bf16.vlgmr.msra.gmra.mxu1 %v503_v48  ;;  %284 = vmatmul.bf16.vlgmr.msra.gmra.mxu3 %v507_v49 }
  0x3f   :  { %220 = vmatmul.bf16.gmra.mxu0 %v504_v50  ;;  %240 = vmatmul.bf16.gmra.mxu2 %v508_v51 }
  0x40   :  { %269 = vmatmul.bf16.gmra.mxu1 %v504_v50  ;;  %289 = vmatmul.bf16.gmra.mxu3 %v508_v51 }
  0x4f   :  { %225 = vmatmul.bf16.gmra.mxu0 %v505_v52  ;;  %245 = vmatmul.bf16.gmra.mxu2 %v509_v53 }
  0x50   :  { %274 = vmatmul.bf16.gmra.mxu1 %v505_v52  ;;  %294 = vmatmul.bf16.gmra.mxu3 %v509_v53 }
  0x5f   :  { %230 = vmatmul.bf16.gmra.mxu0 %v506_v54  ;;  %250 = vmatmul.bf16.gmra.mxu2 %v510_v55 }
  0x60   :  { %279 = vmatmul.bf16.gmra.mxu1 %v506_v54  ;;  %299 = vmatmul.bf16.gmra.mxu3 %v510_v55 }
  0xac   :  { %v216_v56 = vpop.f32.mrf.mxu0 }
  0xad   :  { %v265_v57 = vpop.f32.mrf.mxu1 }
  0xb2   :  { %v236_v58 = vpop.f32.mrf.mxu2 }
  0xb3   :  { %v285_v59 = vpop.f32.mrf.mxu3 }
  0xb4   :  { %v218_v60 = vpop.f32.mrf.mxu0 }
  0xb5   :  { %v530_v61 = vpack.c.bf16 %v218_v60, %v216_v56  ;;  %v267_v62 = vpop.f32.mrf.mxu1 }
  0xb6   :  { %v570_v63 = vpack.c.bf16 %v267_v62, %v265_v57 }
  0xb7   :  { %531 = vst [vmem:[#allocation7] sm:$0xff] %v530_v61  }
  0xb8   :  { %571 = vst [vmem:[#allocation8] sm:$0xff] %v570_v63  }
  0xba   :  { %v238_v0 = vpop.f32.mrf.mxu2 }
  0xbb   :  { %v550_v1 = vpack.c.bf16 %v238_v0, %v236_v58  ;;  %v287_v2 = vpop.f32.mrf.mxu3 }
  0xbc   :  { %v590_v3 = vpack.c.bf16 %v287_v2, %v285_v59  ;;  %v221_v4 = vpop.f32.mrf.mxu0 }
  0xbd   :  { %610 = vst [vmem:[#allocation7 + $0x20] sm:$0xff] %v550_v1   ;;  %v270_v5 = vpop.f32.mrf.mxu1 }
  0xbe   :  { %617 = vst [vmem:[#allocation8 + $0x20] sm:$0xff] %v590_v3  }
  0xc2   :  { %v241_v6 = vpop.f32.mrf.mxu2 }
  0xc3   :  { %v290_v7 = vpop.f32.mrf.mxu3 }
  0xc4   :  { %v223_v8 = vpop.f32.mrf.mxu0 }
  0xc5   :  { %v535_v9 = vpack.c.bf16 %v223_v8, %v221_v4  ;;  %v272_v10 = vpop.f32.mrf.mxu1 }
  0xc6   :  { %v575_v11 = vpack.c.bf16 %v272_v10, %v270_v5 }
  0xc7   :  { %607 = vst [vmem:[#allocation7 + $0x8] sm:$0xff] %v535_v9  }
  0xc8   :  { %614 = vst [vmem:[#allocation8 + $0x8] sm:$0xff] %v575_v11  }
  0xca   :  { %v243_v12 = vpop.f32.mrf.mxu2 }
  0xcb   :  { %v555_v13 = vpack.c.bf16 %v243_v12, %v241_v6  ;;  %v292_v14 = vpop.f32.mrf.mxu3 }
  0xcc   :  { %v595_v15 = vpack.c.bf16 %v292_v14, %v290_v7  ;;  %v226_v16 = vpop.f32.mrf.mxu0 }
  0xcd   :  { %611 = vst [vmem:[#allocation7 + $0x28] sm:$0xff] %v555_v13   ;;  %v275_v17 = vpop.f32.mrf.mxu1 }
  0xce   :  { %618 = vst [vmem:[#allocation8 + $0x28] sm:$0xff] %v595_v15  }
  0xd2   :  { %v246_v18 = vpop.f32.mrf.mxu2 }
  0xd3   :  { %v295_v19 = vpop.f32.mrf.mxu3 }
  0xd4   :  { %v228_v20 = vpop.f32.mrf.mxu0 }
  0xd5   :  { %v540_v21 = vpack.c.bf16 %v228_v20, %v226_v16  ;;  %v277_v22 = vpop.f32.mrf.mxu1 }
  0xd6   :  { %v580_v23 = vpack.c.bf16 %v277_v22, %v275_v17 }
  0xd7   :  { %608 = vst [vmem:[#allocation7 + $0x10] sm:$0xff] %v540_v21  }
  0xd8   :  { %615 = vst [vmem:[#allocation8 + $0x10] sm:$0xff] %v580_v23  }
  0xda   :  { %v248_v24 = vpop.f32.mrf.mxu2 }
  0xdb   :  { %v560_v25 = vpack.c.bf16 %v248_v24, %v246_v18  ;;  %v297_v26 = vpop.f32.mrf.mxu3 }
  0xdc   :  { %v600_v27 = vpack.c.bf16 %v297_v26, %v295_v19  ;;  %v231_v28 = vpop.f32.mrf.mxu0 }
  0xdd   :  { %612 = vst [vmem:[#allocation7 + $0x30] sm:$0xff] %v560_v25   ;;  %v280_v29 = vpop.f32.mrf.mxu1 }
  0xde   :  { %619 = vst [vmem:[#allocation8 + $0x30] sm:$0xff] %v600_v27  }
  0xe2   :  { %v251_v30 = vpop.f32.mrf.mxu2 }
  0xe3   :  { %v300_v31 = vpop.f32.mrf.mxu3 }
  0xe4   :  { %v233_v32 = vpop.f32.mrf.mxu0 }
  0xe5   :  { %v545_v33 = vpack.c.bf16 %v233_v32, %v231_v28  ;;  %v282_v34 = vpop.f32.mrf.mxu1 }
  0xe6   :  { %v585_v35 = vpack.c.bf16 %v282_v34, %v280_v29 }
  0xe7   :  { %609 = vst [vmem:[#allocation7 + $0x18] sm:$0xff] %v545_v33  }
  0xe8   :  { %616 = vst [vmem:[#allocation8 + $0x18] sm:$0xff] %v585_v35  }
  0xea   :  { %v253_v36 = vpop.f32.mrf.mxu2 }
  0xeb   :  { %v565_v37 = vpack.c.bf16 %v253_v36, %v251_v30  ;;  %v302_v38 = vpop.f32.mrf.mxu3 }
  0xec   :  { %v605_v39 = vpack.c.bf16 %v302_v38, %v300_v31 }
  0xed   :  { %613 = vst [vmem:[#allocation7 + $0x38] sm:$0xff] %v565_v37  }
  0xee   :  { %620 = vst [vmem:[#allocation8 + $0x38] sm:$0xff] %v605_v39   ;;  %381 = dma.vmem_to_hbm [thread:$0]  %s374_s25, 1024, %s376_s28, [#allocation4], %s750_s20, %s750_s20, %s751_s21  }
  0xef   :  { %394 = dma.vmem_to_hbm [thread:$0]  %s387_s30, 1024, %s389_s6, [#allocation9], %s750_s20, %s750_s20, %s751_s21  }
  0xf0   :  { %745 = dma.done.wait [#allocation4], 1024  }
  0xf1   :  { %746 = vsyncadd [#allocation4], 4294966272 }
  0xf2   :  { %747 = dma.done.wait [#allocation9], 1024  }
  0xf3   :  { %748 = vsyncadd [#allocation9], 4294966272 }
  0xf4   :  { %403 = vsyncpa [#allocation3], 1 }
  0xf5   :  { %404 = vsyncpa [#allocation6], 1 }
  0xf6   :  { %405 = vsyncpa [#allocation4], 1 }
  0xf7   :  { %406 = vsyncpa [#allocation9], 1 }

</bundles_post_ra>
